<compile_context>
chip_gen: v5e
topology: v5e:2x2
jax: 0.10.0
libtpu: 0.0.40
codegen_flags: <defaults>
</compile_context>

<pallas_src>
import functools

import jax
import jax.numpy as jnp
from jax.experimental import pallas as pl
from jax.experimental.pallas import tpu as pltpu


def _round_up(x: int, m: int) -> int:
    return (x + m - 1) // m * m


def _mutan_kernel(v_ref, q_ref,
                  wv_ref, bv_ref,
                  wq_ref, bq_ref,
                  whv_ref, bhv_ref,
                  whq_ref, bhq_ref,
                  out_ref, *, R: int, dim_mm_p: int):
    # Visual / question embeddings (dropout = identity in eval mode).
    x_v = jnp.tanh(
        jnp.dot(v_ref[...], wv_ref[...], preferred_element_type=jnp.float32)
        + bv_ref[...].astype(jnp.float32))
    x_q = jnp.tanh(
        jnp.dot(q_ref[...], wq_ref[...], preferred_element_type=jnp.float32)
        + bq_ref[...].astype(jnp.float32))

    # One wide MXU matmul per branch (all R rank projections concatenated
    # along the lane axis) instead of 2*R small matmuls.
    hv = (jnp.dot(x_v.astype(whv_ref.dtype), whv_ref[...],
                  preferred_element_type=jnp.float32)
          + bhv_ref[...].astype(jnp.float32))
    hq = (jnp.dot(x_q.astype(whq_ref.dtype), whq_ref[...],
                  preferred_element_type=jnp.float32)
          + bhq_ref[...].astype(jnp.float32))

    # Accumulate the R rank slices (static, 128-aligned lane slices).
    acc = jnp.zeros(out_ref.shape, jnp.float32)
    for i in range(R):  # R is small and static -> unrolled
        lo = i * dim_mm_p
        acc = acc + (jnp.tanh(hv[:, lo:lo + dim_mm_p])
                     * jnp.tanh(hq[:, lo:lo + dim_mm_p]))

    # Single lane-dense store per batch tile (activation_mm = tanh).
    out_ref[...] = jnp.tanh(acc).astype(out_ref.dtype)


def mutan_fusion(input_v, input_q, params, *, R: int,
                 compute_dtype=jnp.float32, batch_tile: int = 128):
    """Full MutanFusion forward as one gridded Pallas call.

    `compute_dtype=jnp.bfloat16` is the recommended setting on v6e/v7x
    (MXU fast path + halved weight DMA); f32 keeps bit-accurate parity
    with the pure-JAX reference.
    """
    B, dim_v = input_v.shape
    dim_q = input_q.shape[1]
    dim_hv = params["Wv"].shape[1]
    dim_hq = params["Wq"].shape[1]
    dim_mm = params["bhv"].shape[-1]

    LANE = 128
    dim_v_p = _round_up(dim_v, LANE)
    dim_q_p = _round_up(dim_q, LANE)
    dim_hv_p = _round_up(dim_hv, LANE)
    dim_hq_p = _round_up(dim_hq, LANE)
    dim_mm_p = _round_up(dim_mm, LANE)

    # Batch tile: multiple of 16 (covers f32 and bf16 sublane packing).
    tb = _round_up(min(batch_tile, _round_up(B, 16)), 16)
    B_p = _round_up(B, tb)

    cdt = jnp.dtype(compute_dtype)

    def pad2(a, rows, cols):
        return jnp.pad(a, ((0, rows - a.shape[0]), (0, cols - a.shape[1])))

    # Zero-pad everything (weights AND biases) so padded lanes stay exactly 0
    # through the tanh chain and the extra rows/cols contribute nothing.
    v_p = pad2(input_v, B_p, dim_v_p).astype(cdt)
    q_p = pad2(input_q, B_p, dim_q_p).astype(cdt)

    wv_p = pad2(params["Wv"], dim_v_p, dim_hv_p).astype(cdt)
    bv_p = pad2(params["bv"], 1, dim_hv_p).astype(cdt)
    wq_p = pad2(params["Wq"], dim_q_p, dim_hq_p).astype(cdt)
    bq_p = pad2(params["bq"], 1, dim_hq_p).astype(cdt)

    def cat_rank(w, b, d_in_p):
        # (R, d_in, dim_mm) -> zero-pad -> (d_in_p, R * dim_mm_p)
        w_pad = jnp.pad(w, ((0, 0),
                            (0, d_in_p - w.shape[1]),
                            (0, dim_mm_p - w.shape[2])))
        w_cat = jnp.transpose(w_pad, (1, 0, 2)).reshape(d_in_p, R * dim_mm_p)
        b_cat = jnp.pad(b, ((0, 0), (0, dim_mm_p - b.shape[1]))
                        ).reshape(1, R * dim_mm_p)
        return w_cat.astype(cdt), b_cat.astype(cdt)

    whv_c, bhv_c = cat_rank(params["Whv"], params["bhv"], dim_hv_p)
    whq_c, bhq_c = cat_rank(params["Whq"], params["bhq"], dim_hq_p)

    grid = (B_p // tb,)
    batch_map = lambda b: (b, 0)   # noqa: E731  (batch-tiled operands)
    const_map = lambda b: (0, 0)   # noqa: E731  (weights stay VMEM-resident)

    in_specs = [
        pl.BlockSpec((tb, dim_v_p), batch_map),
        pl.BlockSpec((tb, dim_q_p), batch_map),
        pl.BlockSpec((dim_v_p, dim_hv_p), const_map),
        pl.BlockSpec((1, dim_hv_p), const_map),
        pl.BlockSpec((dim_q_p, dim_hq_p), const_map),
        pl.BlockSpec((1, dim_hq_p), const_map),
        pl.BlockSpec((dim_hv_p, R * dim_mm_p), const_map),
        pl.BlockSpec((1, R * dim_mm_p), const_map),
        pl.BlockSpec((dim_hq_p, R * dim_mm_p), const_map),
        pl.BlockSpec((1, R * dim_mm_p), const_map),
    ]
    out_spec = pl.BlockSpec((tb, dim_mm_p), batch_map)

    # VMEM budget: resident weights (x2 for buffering slack) + double-buffered
    # activation tiles + margin; clamped to stay safe on v7x's 64 MiB VMEM.
    itemsize = cdt.itemsize
    w_bytes = sum(int(x.size) * x.dtype.itemsize
                  for x in (wv_p, bv_p, wq_p, bq_p, whv_c, bhv_c, whq_c, bhq_c))
    act_bytes = 2 * tb * (dim_v_p + dim_q_p) * itemsize + 2 * tb * dim_mm_p * 4
    vmem_limit = int(min(max(2 * w_bytes + 2 * act_bytes + (8 << 20), 32 << 20),
                         48 << 20))

    flops = 2 * B_p * (dim_v_p * dim_hv_p + dim_q_p * dim_hq_p
                       + (dim_hv_p + dim_hq_p) * R * dim_mm_p)
    transcendentals = B_p * (dim_hv_p + dim_hq_p + (2 * R + 1) * dim_mm_p)
    bytes_accessed = ((int(v_p.size) + int(q_p.size)) * itemsize
                      + w_bytes + B_p * dim_mm_p * 4)

    kernel = functools.partial(_mutan_kernel, R=R, dim_mm_p=dim_mm_p)

    out_p = pl.pallas_call(
        kernel,
        out_shape=jax.ShapeDtypeStruct((B_p, dim_mm_p), jnp.float32),
        grid=grid,
        in_specs=in_specs,
        out_specs=out_spec,
        compiler_params=pltpu.CompilerParams(
            dimension_semantics=("parallel",),
            vmem_limit_bytes=vmem_limit),
        cost_estimate=pl.CostEstimate(
            flops=int(flops),
            transcendentals=int(transcendentals),
            bytes_accessed=int(bytes_accessed)),
    )(v_p, q_p, wv_p, bv_p, wq_p, bq_p, whv_c, bhv_c, whq_c, bhq_c)

    # Strip the batch / lane padding back off.
    return out_p[:B, :dim_mm]


def init_params(key, dim_v, dim_q, dim_hv, dim_hq, dim_mm, R):
    """nn.Linear-style init; weights stored (in_dim, out_dim) so kernel does x @ W + b."""
    ks = jax.random.split(key, 8)

    def lin(k, fan_in, shape):
        bound = 1.0 / jnp.sqrt(jnp.float32(fan_in))
        return jax.random.uniform(k, shape, jnp.float32, -bound, bound)

    return {
        "Wv":  lin(ks[0], dim_v, (dim_v, dim_hv)),
        "bv":  lin(ks[1], dim_v, (1, dim_hv)),
        "Wq":  lin(ks[2], dim_q, (dim_q, dim_hq)),
        "bq":  lin(ks[3], dim_q, (1, dim_hq)),
        "Whv": lin(ks[4], dim_hv, (R, dim_hv, dim_mm)),
        "bhv": lin(ks[5], dim_hv, (R, dim_mm)),
        "Whq": lin(ks[6], dim_hq, (R, dim_hq, dim_mm)),
        "bhq": lin(ks[7], dim_hq, (R, dim_mm)),
    }


def mutan_fusion_ref(input_v, input_q, p, *, R):
    """Pure-JAX reference of the PyTorch forward (eval mode)."""
    x_v = jnp.tanh(input_v @ p["Wv"] + p["bv"])
    x_q = jnp.tanh(input_q @ p["Wq"] + p["bq"])
    acc = 0.0
    for i in range(R):
        x_hv = jnp.tanh(x_v @ p["Whv"][i] + p["bhv"][i])
        x_hq = jnp.tanh(x_q @ p["Whq"][i] + p["bhq"][i])
        acc = acc + x_hq * x_hv
    return jnp.tanh(acc)


if __name__ == "__main__":
    # Small opt: dim_v=32, dim_q=24, dim_hv=40, dim_hq=48, dim_mm=64, R=3
    # TODO(synk): F.dropout is training-mode only; eval-mode forward (identity) implemented.
    B, dim_v, dim_q = 2, 32, 24
    dim_hv, dim_hq, dim_mm, R = 40, 48, 64, 3

    key = jax.random.PRNGKey(0)
    k_v, k_q, k_p = jax.random.split(key, 3)
    input_v = jax.random.normal(k_v, (B, dim_v), jnp.float32)
    input_q = jax.random.normal(k_q, (B, dim_q), jnp.float32)
    params = init_params(k_p, dim_v, dim_q, dim_hv, dim_hq, dim_mm, R)

    ref = mutan_fusion_ref(input_v, input_q, params, R=R)

    # f32 path: bit-level parity with the reference.
    out = mutan_fusion(input_v, input_q, params, R=R, compute_dtype=jnp.float32)
    out = jax.block_until_ready(out)
    assert out.shape == (B, dim_mm)
    assert jnp.allclose(out, ref, atol=1e-5, rtol=1e-5)

    # bf16 path (v6e/v7x fast path): looser tolerance, tanh-bounded outputs.
    out_bf16 = mutan_fusion(input_v, input_q, params, R=R,
                            compute_dtype=jnp.bfloat16)
    out_bf16 = jax.block_until_ready(out_bf16)
    assert jnp.allclose(out_bf16, ref, atol=5e-2, rtol=5e-2)

    print("KERNEL_OK")
</pallas_src>

<mosaic_0001>
module attributes {stable_mosaic.version = 11 : i64} {
  func.func @_mutan_kernel(%arg0: i32, %arg1: memref<16x128xf32, #tpu.memory_space<vmem>>, %arg2: memref<16x128xf32, #tpu.memory_space<vmem>>, %arg3: memref<128x128xf32, #tpu.memory_space<vmem>>, %arg4: memref<1x128xf32, #tpu.memory_space<vmem>>, %arg5: memref<128x128xf32, #tpu.memory_space<vmem>>, %arg6: memref<1x128xf32, #tpu.memory_space<vmem>>, %arg7: memref<128x384xf32, #tpu.memory_space<vmem>>, %arg8: memref<1x384xf32, #tpu.memory_space<vmem>>, %arg9: memref<128x384xf32, #tpu.memory_space<vmem>>, %arg10: memref<1x384xf32, #tpu.memory_space<vmem>>, %arg11: memref<16x128xf32, #tpu.memory_space<vmem>>) attributes {dimension_semantics = [#tpu.dimension_semantics<parallel>], iteration_bounds = array<i64: 1>, scalar_prefetch = 0 : i64, scratch_operands = 0 : i64, tpu.core_type = #tpu.core_type<tc>, window_params = [{transform_indices = @transform_0, window_bounds = array<i64: 16, 128>}, {transform_indices = @transform_1, window_bounds = array<i64: 16, 128>}, {pipeline_mode = #tpu.pipeline_mode<synchronous>, transform_indices = @transform_2, window_bounds = array<i64: 128, 128>}, {pipeline_mode = #tpu.pipeline_mode<synchronous>, transform_indices = @transform_3, window_bounds = array<i64: 1, 128>}, {pipeline_mode = #tpu.pipeline_mode<synchronous>, transform_indices = @transform_4, window_bounds = array<i64: 128, 128>}, {pipeline_mode = #tpu.pipeline_mode<synchronous>, transform_indices = @transform_5, window_bounds = array<i64: 1, 128>}, {pipeline_mode = #tpu.pipeline_mode<synchronous>, transform_indices = @transform_6, window_bounds = array<i64: 128, 384>}, {pipeline_mode = #tpu.pipeline_mode<synchronous>, transform_indices = @transform_7, window_bounds = array<i64: 1, 384>}, {pipeline_mode = #tpu.pipeline_mode<synchronous>, transform_indices = @transform_8, window_bounds = array<i64: 128, 384>}, {pipeline_mode = #tpu.pipeline_mode<synchronous>, transform_indices = @transform_9, window_bounds = array<i64: 1, 384>}, {transform_indices = @transform_10, window_bounds = array<i64: 16, 128>}]} {
    %c0 = arith.constant 0 : index
    %c0_0 = arith.constant 0 : index
    %0 = vector.load %arg1[%c0, %c0_0] : memref<16x128xf32, #tpu.memory_space<vmem>>, vector<16x128xf32>
    %c0_1 = arith.constant 0 : index
    %c0_2 = arith.constant 0 : index
    %1 = vector.load %arg3[%c0_1, %c0_2] : memref<128x128xf32, #tpu.memory_space<vmem>>, vector<128x128xf32>
    %cst = arith.constant dense<0.000000e+00> : vector<16x128xf32>
    %2 = tpu.matmul %0, %1, %cst {dimension_numbers = #tpu.dot_dimension_numbers<[1], [0], [0], [1], [0, 0, 1, 1], [], []>} : vector<16x128xf32>, vector<128x128xf32>, vector<16x128xf32> -> vector<16x128xf32>
    %c0_3 = arith.constant 0 : index
    %c0_4 = arith.constant 0 : index
    %3 = vector.load %arg4[%c0_3, %c0_4] : memref<1x128xf32, #tpu.memory_space<vmem>>, vector<1x128xf32>
    %4 = vector.broadcast %3 : vector<1x128xf32> to vector<16x128xf32>
    %5 = arith.addf %2, %4 : vector<16x128xf32>
    %6 = math.tanh %5 : vector<16x128xf32>
    %c0_5 = arith.constant 0 : index
    %c0_6 = arith.constant 0 : index
    %7 = vector.load %arg2[%c0_5, %c0_6] : memref<16x128xf32, #tpu.memory_space<vmem>>, vector<16x128xf32>
    %c0_7 = arith.constant 0 : index
    %c0_8 = arith.constant 0 : index
    %8 = vector.load %arg5[%c0_7, %c0_8] : memref<128x128xf32, #tpu.memory_space<vmem>>, vector<128x128xf32>
    %cst_9 = arith.constant dense<0.000000e+00> : vector<16x128xf32>
    %9 = tpu.matmul %7, %8, %cst_9 {dimension_numbers = #tpu.dot_dimension_numbers<[1], [0], [0], [1], [0, 0, 1, 1], [], []>} : vector<16x128xf32>, vector<128x128xf32>, vector<16x128xf32> -> vector<16x128xf32>
    %c0_10 = arith.constant 0 : index
    %c0_11 = arith.constant 0 : index
    %10 = vector.load %arg6[%c0_10, %c0_11] : memref<1x128xf32, #tpu.memory_space<vmem>>, vector<1x128xf32>
    %11 = vector.broadcast %10 : vector<1x128xf32> to vector<16x128xf32>
    %12 = arith.addf %9, %11 : vector<16x128xf32>
    %13 = math.tanh %12 : vector<16x128xf32>
    %c0_12 = arith.constant 0 : index
    %c0_13 = arith.constant 0 : index
    %14 = vector.load %arg7[%c0_12, %c0_13] : memref<128x384xf32, #tpu.memory_space<vmem>>, vector<128x384xf32>
    %cst_14 = arith.constant dense<0.000000e+00> : vector<16x384xf32>
    %15 = tpu.matmul %6, %14, %cst_14 {dimension_numbers = #tpu.dot_dimension_numbers<[1], [0], [0], [1], [0, 0, 1, 1], [], []>} : vector<16x128xf32>, vector<128x384xf32>, vector<16x384xf32> -> vector<16x384xf32>
    %c0_15 = arith.constant 0 : index
    %c0_16 = arith.constant 0 : index
    %16 = vector.load %arg8[%c0_15, %c0_16] : memref<1x384xf32, #tpu.memory_space<vmem>>, vector<1x384xf32>
    %17 = vector.broadcast %16 : vector<1x384xf32> to vector<16x384xf32>
    %18 = arith.addf %15, %17 : vector<16x384xf32>
    %c0_17 = arith.constant 0 : index
    %c0_18 = arith.constant 0 : index
    %19 = vector.load %arg9[%c0_17, %c0_18] : memref<128x384xf32, #tpu.memory_space<vmem>>, vector<128x384xf32>
    %cst_19 = arith.constant dense<0.000000e+00> : vector<16x384xf32>
    %20 = tpu.matmul %13, %19, %cst_19 {dimension_numbers = #tpu.dot_dimension_numbers<[1], [0], [0], [1], [0, 0, 1, 1], [], []>} : vector<16x128xf32>, vector<128x384xf32>, vector<16x384xf32> -> vector<16x384xf32>
    %c0_20 = arith.constant 0 : index
    %c0_21 = arith.constant 0 : index
    %21 = vector.load %arg10[%c0_20, %c0_21] : memref<1x384xf32, #tpu.memory_space<vmem>>, vector<1x384xf32>
    %22 = vector.broadcast %21 : vector<1x384xf32> to vector<16x384xf32>
    %23 = arith.addf %20, %22 : vector<16x384xf32>
    %cst_22 = arith.constant 0.000000e+00 : f32
    %24 = vector.broadcast %cst_22 : f32 to vector<16x128xf32>
    %25 = vector.extract_strided_slice %18 {offsets = [0, 0], sizes = [16, 128], strides = [1, 1]} : vector<16x384xf32> to vector<16x128xf32>
    %26 = math.tanh %25 : vector<16x128xf32>
    %27 = vector.extract_strided_slice %23 {offsets = [0, 0], sizes = [16, 128], strides = [1, 1]} : vector<16x384xf32> to vector<16x128xf32>
    %28 = math.tanh %27 : vector<16x128xf32>
    %29 = arith.mulf %26, %28 : vector<16x128xf32>
    %30 = arith.addf %24, %29 : vector<16x128xf32>
    %31 = vector.extract_strided_slice %18 {offsets = [0, 128], sizes = [16, 128], strides = [1, 1]} : vector<16x384xf32> to vector<16x128xf32>
    %32 = math.tanh %31 : vector<16x128xf32>
    %33 = vector.extract_strided_slice %23 {offsets = [0, 128], sizes = [16, 128], strides = [1, 1]} : vector<16x384xf32> to vector<16x128xf32>
    %34 = math.tanh %33 : vector<16x128xf32>
    %35 = arith.mulf %32, %34 : vector<16x128xf32>
    %36 = arith.addf %30, %35 : vector<16x128xf32>
    %37 = vector.extract_strided_slice %18 {offsets = [0, 256], sizes = [16, 128], strides = [1, 1]} : vector<16x384xf32> to vector<16x128xf32>
    %38 = math.tanh %37 : vector<16x128xf32>
    %39 = vector.extract_strided_slice %23 {offsets = [0, 256], sizes = [16, 128], strides = [1, 1]} : vector<16x384xf32> to vector<16x128xf32>
    %40 = math.tanh %39 : vector<16x128xf32>
    %41 = arith.mulf %38, %40 : vector<16x128xf32>
    %42 = arith.addf %36, %41 : vector<16x128xf32>
    %43 = math.tanh %42 : vector<16x128xf32>
    %c0_23 = arith.constant 0 : index
    %c0_24 = arith.constant 0 : index
    %44 = vector.load %arg11[%c0_23, %c0_24] : memref<16x128xf32, #tpu.memory_space<vmem>>, vector<16x128xf32>
    tpu.vector_store %arg11[%c0_23, %c0_24], %43 {strides = array<i32>} : memref<16x128xf32, #tpu.memory_space<vmem>>, vector<16x128xf32>,
    return
  }
  func.func @transform_0(%arg0: i32) -> (i32, i32) {
    %c0_i32 = arith.constant 0 : i32
    %c0_i32_0 = arith.constant 0 : i32
    return %arg0, %c0_i32 : i32, i32
  }
  func.func @transform_1(%arg0: i32) -> (i32, i32) {
    %c0_i32 = arith.constant 0 : i32
    %c0_i32_0 = arith.constant 0 : i32
    return %arg0, %c0_i32 : i32, i32
  }
  func.func @transform_2(%arg0: i32) -> (i32, i32) {
    %c0_i32 = arith.constant 0 : i32
    %c0_i32_0 = arith.constant 0 : i32
    %c0_i32_1 = arith.constant 0 : i32
    return %c0_i32, %c0_i32_0 : i32, i32
  }
  func.func @transform_3(%arg0: i32) -> (i32, i32) {
    %c0_i32 = arith.constant 0 : i32
    %c0_i32_0 = arith.constant 0 : i32
    %c0_i32_1 = arith.constant 0 : i32
    return %c0_i32, %c0_i32_0 : i32, i32
  }
  func.func @transform_4(%arg0: i32) -> (i32, i32) {
    %c0_i32 = arith.constant 0 : i32
    %c0_i32_0 = arith.constant 0 : i32
    %c0_i32_1 = arith.constant 0 : i32
    return %c0_i32, %c0_i32_0 : i32, i32
  }
  func.func @transform_5(%arg0: i32) -> (i32, i32) {
    %c0_i32 = arith.constant 0 : i32
    %c0_i32_0 = arith.constant 0 : i32
    %c0_i32_1 = arith.constant 0 : i32
    return %c0_i32, %c0_i32_0 : i32, i32
  }
  func.func @transform_6(%arg0: i32) -> (i32, i32) {
    %c0_i32 = arith.constant 0 : i32
    %c0_i32_0 = arith.constant 0 : i32
    %c0_i32_1 = arith.constant 0 : i32
    return %c0_i32, %c0_i32_0 : i32, i32
  }
  func.func @transform_7(%arg0: i32) -> (i32, i32) {
    %c0_i32 = arith.constant 0 : i32
    %c0_i32_0 = arith.constant 0 : i32
    %c0_i32_1 = arith.constant 0 : i32
    return %c0_i32, %c0_i32_0 : i32, i32
  }
  func.func @transform_8(%arg0: i32) -> (i32, i32) {
    %c0_i32 = arith.constant 0 : i32
    %c0_i32_0 = arith.constant 0 : i32
    %c0_i32_1 = arith.constant 0 : i32
    return %c0_i32, %c0_i32_0 : i32, i32
  }
  func.func @transform_9(%arg0: i32) -> (i32, i32) {
    %c0_i32 = arith.constant 0 : i32
    %c0_i32_0 = arith.constant 0 : i32
    %c0_i32_1 = arith.constant 0 : i32
    return %c0_i32, %c0_i32_0 : i32, i32
  }
  func.func @transform_10(%arg0: i32) -> (i32, i32) {
    %c0_i32 = arith.constant 0 : i32
    %c0_i32_0 = arith.constant 0 : i32
    return %arg0, %c0_i32 : i32, i32
  }
}

</mosaic_0001>

<bundles_post_ra>
// kernel: tpu_custom_call.1
= control target key start
LH: loop header
LB: loop body
LE: loop exit
PB: predicated region body
PF: predicated region fallthrough
CT: control target
= control target key end

     0   :  { %15 = vsyncpa [#allocation3], 0  ;;  %s947_s0 = inlined_call_operand.hbm [shape: f32[16,128], index: 0, kind: input, shape index: {}]   ;;  %s948_s1 = inlined_call_operand.hbm [shape: f32[16,128], index: 1, kind: input, shape index: {}]   ;;  %s949_s2 = inlined_call_operand.hbm [shape: f32[128,128], index: 2, kind: input, shape index: {}]   ;;  %s950_s3 = inlined_call_operand.hbm [shape: f32[1,128], index: 3, kind: input, shape index: {}]   ;;  %s951_s4 = inlined_call_operand.hbm [shape: f32[128,128], index: 4, kind: input, shape index: {}]   ;;  %s952_s5 = inlined_call_operand.hbm [shape: f32[1,128], index: 5, kind: input, shape index: {}]   ;;  %s953_s6 = inlined_call_operand.hbm [shape: f32[128,384], index: 6, kind: input, shape index: {}]   ;;  %s954_s7 = inlined_call_operand.vmem [shape: f32[1,384], index: 7, kind: input, shape index: {}]   ;;  %s955_s8 = inlined_call_operand.hbm [shape: f32[128,384], index: 8, kind: input, shape index: {}]   ;;  %s956_s9 = inlined_call_operand.vmem [shape: f32[1,384], index: 9, kind: input, shape index: {}]   ;;  %s957_s10 = inlined_call_operand.hbm [shape: f32[16,128], index: 10, kind: output, shape index: {}]  }
   0x1   :  { %16 = vsyncpa [#allocation6], 0 }
   0x2   :  { %17 = vsyncpa [#allocation9], 0 }
   0x3   :  { %18 = vsyncpa [#allocation12], 0 }
   0x4   :  { %19 = vsyncpa [#allocation15], 0 }
   0x5   :  { %20 = vsyncpa [#allocation4], 0  ;;  %s38_s15 = sshll.u32 %s948_s1, 4  ;;  %s831_s16 = smov [#allocation5]   ;;  %s39_s15 = int_to_ptr.hbm [resolvable:$true] %s38_s15 }
   0x6   :  { %s40_s17 = sshll.u32 %s831_s16, 4  ;;  %s65_s20 = sshll.u32 %s950_s3, 4  ;;  %s41_s17 = int_to_ptr.vmem [resolvable:$true] %s40_s17  ;;  %s66_s20 = int_to_ptr.hbm [resolvable:$true] %s65_s20 }
   0x7   :  { %s832_s21 = smov 128   ;;  %s833_s22 = smov 8  }
   0x8   :  { %46 = dma.hbm_to_vmem [thread:$0]  %s39_s15, 256, %s41_s17, [#allocation6], %s832_s21, %s832_s21, %s833_s22  }
   0x9   :  { %s834_s23 = smov [#allocation8]   ;;  %s89_s1 = sshll.u32 %s952_s5, 4  ;;  %s90_s1 = int_to_ptr.hbm [resolvable:$true] %s89_s1 }
   0xa   :  { %s67_s24 = sshll.u32 %s834_s23, 4  ;;  %s25_s3 = sshll.u32 %s947_s0, 4  ;;  %s68_s24 = int_to_ptr.vmem [resolvable:$true] %s67_s24  ;;  %s26_s3 = int_to_ptr.hbm [resolvable:$true] %s25_s3 }
   0xb   :  { %70 = dma.hbm_to_vmem [thread:$0]  %s66_s20, 16, %s68_s24, [#allocation9]  }
   0xc   :  { %s835_s29 = smov [#allocation11]   ;;  %s836_s11 = smov [#allocation2]  }
   0xd   :  { %s91_s30 = sshll.u32 %s835_s29, 4  ;;  %s27_s12 = sshll.u32 %s836_s11, 4  ;;  %s92_s30 = int_to_ptr.vmem [resolvable:$true] %s91_s30  ;;  %s28_s12 = int_to_ptr.vmem [resolvable:$true] %s27_s12 }
   0xe   :  { %94 = dma.hbm_to_vmem [thread:$0]  %s90_s1, 16, %s92_s30, [#allocation12]  }
   0xf   :  { %s51_s15 = sshll.u32 %s949_s2, 4  ;;  %s75_s0 = sshll.u32 %s951_s4, 4  ;;  %s52_s15 = int_to_ptr.hbm [resolvable:$true] %s51_s15  ;;  %s76_s0 = int_to_ptr.hbm [resolvable:$true] %s75_s0 }
  0x10   :  { %33 = dma.hbm_to_vmem [thread:$0]  %s26_s3, 256, %s28_s12, [#allocation3], %s832_s21, %s832_s21, %s833_s22  }
  0x11   :  { %s837_s17 = smov [#allocation7]   ;;  %s838_s19 = smov [#allocation10]  }
  0x12   :  { %s53_s18 = sshll.u32 %s837_s17, 4  ;;  %s77_s2 = sshll.u32 %s838_s19, 4  ;;  %s54_s18 = int_to_ptr.vmem [resolvable:$true] %s53_s18  ;;  %s78_s2 = int_to_ptr.vmem [resolvable:$true] %s77_s2 }
  0x13   :  { %59 = dma.hbm_to_vmem [thread:$0]  %s52_s15, 2048, %s54_s18, [#allocation6], %s832_s21, %s832_s21, %s833_s22  }
  0x14   :  { %s99_s24 = sshll.u32 %s953_s6, 4  ;;  %s839_s4 = smov [#allocation13]   ;;  %s100_s24 = int_to_ptr.hbm [resolvable:$true] %s99_s24 }
  0x15   :  { %83 = dma.hbm_to_vmem [thread:$0]  %s76_s0, 2048, %s78_s2, [#allocation9], %s832_s21, %s832_s21, %s833_s22  }
  0x16   :  { %s101_s25 = sshll.u32 %s839_s4, 4  ;;  %s114_s27 = sshll.u32 %s955_s8, 4  ;;  %s102_s25 = int_to_ptr.vmem [resolvable:$true] %s101_s25  ;;  %s115_s27 = int_to_ptr.hbm [resolvable:$true] %s114_s27 }
  0x17   :  { %s840_s28 = smov 384   ;;  %s841_s3 = smov 24  }
  0x18   :  { %107 = dma.hbm_to_vmem [thread:$0]  %s100_s24, 6144, %s102_s25, [#allocation12], %s840_s28, %s840_s28, %s841_s3  }
  0x19   :  { %s842_s29 = smov [#allocation14]  }
  0x1a   :  { %s116_s30 = sshll.u32 %s842_s29, 4  ;;  %s117_s30 = int_to_ptr.vmem [resolvable:$true] %s116_s30 }
  0x1b   :  { %122 = dma.hbm_to_vmem [thread:$0]  %s115_s27, 6144, %s117_s30, [#allocation15], %s840_s28, %s840_s28, %s841_s3  }
  0x1c   :  { %819 = dma.done.wait [#allocation3], 256  }
  0x1d   :  { %820 = vsyncadd [#allocation3], 4294967040 }
  0x1e   :  { %821 = dma.done.wait [#allocation6], 2304  }
  0x1f   :  { %822 = vsyncadd [#allocation6], 4294964992 }
  0x20   :  { %823 = dma.done.wait [#allocation9], 2064  }
  0x21   :  { %824 = vsyncadd [#allocation9], 4294965232 }
  0x22   :  { %825 = dma.done.wait [#allocation12], 6160  }
  0x23   :  { %826 = vsyncadd [#allocation12], 4294961136 }
  0x24   :  { %827 = dma.done.wait [#allocation15], 6144  }
  0x25   :  { %828 = vsyncadd [#allocation15], 4294961152  ;;  %v174_v0 = vld [vmem:[#allocation7 + $0x78] sm:$0xff]  ;;  %v173_v1 = vld [vmem:[#allocation7 + $0x70] sm:$0xff]  ;;  %s535_s15 = sshll.u32 %s957_s10, 4  ;;  %s536_s15 = int_to_ptr.hbm [resolvable:$true] %s535_s15 }
  0x26   :  { %179 = vmatpush.msra.mxu0 %v174_v0  ;;  %v221_v2 = vld [vmem:[#allocation10 + $0x78] sm:$0xff]  ;;  %v172_v3 = vld [vmem:[#allocation7 + $0x68] sm:$0xff]  ;;  %v220_v4 = vld [vmem:[#allocation10 + $0x70] sm:$0xff] }
  0x27   :  { %226 = vmatpush.msra.mxu1 %v221_v2  ;;  %v219_v5 = vld [vmem:[#allocation10 + $0x68] sm:$0xff]  ;;  %v171_v6 = vld [vmem:[#allocation7 + $0x60] sm:$0xff]  ;;  %v170_v8 = vld [vmem:[#allocation7 + $0x58] sm:$0xff] }
  0x28   :  { %180 = vmatpush.msra.mxu0 %v173_v1  ;;  %v218_v7 = vld [vmem:[#allocation10 + $0x60] sm:$0xff]  ;;  %v217_v9 = vld [vmem:[#allocation10 + $0x58] sm:$0xff]  ;;  %v169_v10 = vld [vmem:[#allocation7 + $0x50] sm:$0xff] }
  0x29   :  { %227 = vmatpush.msra.mxu1 %v220_v4  ;;  %v216_v11 = vld [vmem:[#allocation10 + $0x50] sm:$0xff]  ;;  %v168_v12 = vld [vmem:[#allocation7 + $0x48] sm:$0xff]  ;;  %v167_v13 = vld [vmem:[#allocation7 + $0x40] sm:$0xff] }
  0x2a   :  { %181 = vmatpush.msra.mxu0 %v172_v3  ;;  %v215_v14 = vld [vmem:[#allocation10 + $0x48] sm:$0xff]  ;;  %v297_v16 = vld [vmem:[#allocation13 + $0x170] sm:$0xff]  ;;  %v214_v18 = vld [vmem:[#allocation10 + $0x40] sm:$0xff] }
  0x2b   :  { %228 = vmatpush.msra.mxu1 %v219_v5  ;;  %v296_v15 = vld [vmem:[#allocation13 + $0x168] sm:$0xff]  ;;  %v293_v17 = vld [vmem:[#allocation13 + $0x150] sm:$0xff]  ;;  %v294_v19 = vld [vmem:[#allocation13 + $0x158] sm:$0xff]  ;;  %330 = vmatpush.msra.mxu3 %v297_v16 }
  0x2c   :  { %182 = vmatpush.msra.mxu0 %v171_v6  ;;  %307 = vmatpush.msra.mxu2 %v296_v15  ;;  %v166_v20 = vld [vmem:[#allocation7 + $0x38] sm:$0xff]  ;;  %v291_v23 = vld [vmem:[#allocation13 + $0x140] sm:$0xff]  ;;  %v165_v24 = vld [vmem:[#allocation7 + $0x30] sm:$0xff] }
  0x2d   :  { %229 = vmatpush.msra.mxu1 %v218_v7  ;;  %v290_v21 = vld [vmem:[#allocation13 + $0x138] sm:$0xff]  ;;  %331 = vmatpush.msra.mxu3 %v294_v19  ;;  %v287_v25 = vld [vmem:[#allocation13 + $0x120] sm:$0xff]  ;;  %v212_v26 = vld [vmem:[#allocation10 + $0x30] sm:$0xff] }
  0x2e   :  { %183 = vmatpush.msra.mxu0 %v170_v8  ;;  %v213_v22 = vld [vmem:[#allocation10 + $0x38] sm:$0xff]  ;;  %308 = vmatpush.msra.mxu2 %v293_v17  ;;  %v288_v27 = vld [vmem:[#allocation13 + $0x128] sm:$0xff]  ;;  %v210_v34 = vld [vmem:[#allocation10 + $0x20] sm:$0xff] }
  0x2f   :  { %230 = vmatpush.msra.mxu1 %v217_v9  ;;  %v164_v28 = vld [vmem:[#allocation7 + $0x28] sm:$0xff]  ;;  %332 = vmatpush.msra.mxu3 %v291_v23  ;;  %v285_v31 = vld [vmem:[#allocation13 + $0x110] sm:$0xff]  ;;  %v163_v32 = vld [vmem:[#allocation7 + $0x20] sm:$0xff] }
  0x30   :  { %184 = vmatpush.msra.mxu0 %v169_v10  ;;  %309 = vmatpush.msra.mxu2 %v290_v21  ;;  %v284_v29 = vld [vmem:[#allocation13 + $0x108] sm:$0xff]  ;;  %v281_v33 = vld [vmem:[#allocation13 + $0xf0] sm:$0xff]  ;;  %v282_v35 = vld [vmem:[#allocation13 + $0xf8] sm:$0xff] }
  0x31   :  { %231 = vmatpush.msra.mxu1 %v216_v11  ;;  %v211_v30 = vld [vmem:[#allocation10 + $0x28] sm:$0xff]  ;;  %333 = vmatpush.msra.mxu3 %v288_v27  ;;  %v162_v36 = vld [vmem:[#allocation7 + $0x18] sm:$0xff]  ;;  %v159_v48 = vld [vmem:[#allocation7] sm:$0xff] }
  0x32   :  { %185 = vmatpush.msra.mxu0 %v168_v12  ;;  %310 = vmatpush.msra.mxu2 %v287_v25  ;;  %v278_v37 = vld [vmem:[#allocation13 + $0xd8] sm:$0xff]  ;;  %v279_v39 = vld [vmem:[#allocation13 + $0xe0] sm:$0xff]  ;;  %v161_v40 = vld [vmem:[#allocation7 + $0x10] sm:$0xff] }
  0x33   :  { %232 = vmatpush.msra.mxu1 %v215_v14  ;;  %334 = vmatpush.msra.mxu3 %v285_v31  ;;  %v209_v38 = vld [vmem:[#allocation10 + $0x18] sm:$0xff]  ;;  %v275_v41 = vld [vmem:[#allocation13 + $0xc0] sm:$0xff]  ;;  %v208_v42 = vld [vmem:[#allocation10 + $0x10] sm:$0xff] }
  0x34   :  { %186 = vmatpush.msra.mxu0 %v167_v13  ;;  %311 = vmatpush.msra.mxu2 %v284_v29  ;;  %v276_v43 = vld [vmem:[#allocation13 + $0xc8] sm:$0xff]  ;;  %v273_v47 = vld [vmem:[#allocation13 + $0xb0] sm:$0xff]  ;;  %v157_v50 = vld [vmem:[#allocation2] sm:$0xff] }
  0x35   :  { %233 = vmatpush.msra.mxu1 %v214_v18  ;;  %335 = vmatpush.msra.mxu3 %v282_v35  ;;  %v160_v44 = vld [vmem:[#allocation7 + $0x8] sm:$0xff]  ;;  %v269_v49 = vld [vmem:[#allocation13 + $0x90] sm:$0xff]  ;;  %v298_v53 = vld [vmem:[#allocation13 + $0x178] sm:$0xff] }
  0x36   :  { %187 = vmatpush.msra.mxu0 %v166_v20  ;;  %312 = vmatpush.msra.mxu2 %v281_v33  ;;  %v272_v45 = vld [vmem:[#allocation13 + $0xa8] sm:$0xff]  ;;  %v206_v51 = vld [vmem:[#allocation10] sm:$0xff]  ;;  %v418_v61 = vld [vmem:[#allocation14 + $0x150] sm:$0xff] }
  0x37   :  { %234 = vmatpush.msra.mxu1 %v213_v22  ;;  %336 = vmatpush.msra.mxu3 %v279_v39  ;;  %v207_v46 = vld [vmem:[#allocation10 + $0x8] sm:$0xff]  ;;  %v270_v54 = vld [vmem:[#allocation13 + $0x98] sm:$0xff]  ;;  %v289_v0 = vld [vmem:[#allocation13 + $0x130] sm:$0xff] }
  0x38   :  { %188 = vmatpush.msra.mxu0 %v165_v24  ;;  %313 = vmatpush.msra.mxu2 %v278_v37  ;;  %v204_v52 = vld [vmem:[#allocation5] sm:$0xff]  ;;  %v266_v55 = vld [vmem:[#allocation13 + $0x78] sm:$0xff]  ;;  %v295_v56 = vld [vmem:[#allocation13 + $0x160] sm:$0xff] }
  0x39   :  { %235 = vmatpush.msra.mxu1 %v212_v26  ;;  %337 = vmatpush.msra.mxu3 %v276_v43  ;;  %v421_v57 = vld [vmem:[#allocation14 + $0x168] sm:$0xff]  ;;  %v267_v58 = vld [vmem:[#allocation13 + $0x80] sm:$0xff]  ;;  %v415_v1 = vld [vmem:[#allocation14 + $0x138] sm:$0xff] }
  0x3a   :  { %189 = vmatpush.msra.mxu0 %v164_v28  ;;  %314 = vmatpush.msra.mxu2 %v275_v41  ;;  %v263_v59 = vld [vmem:[#allocation13 + $0x60] sm:$0xff]  ;;  %v292_v60 = vld [vmem:[#allocation13 + $0x148] sm:$0xff]  ;;  %v261_v3 = vld [vmem:[#allocation13 + $0x50] sm:$0xff] }
  0x3b   :  { %236 = vmatpush.msra.mxu1 %v211_v30  ;;  %338 = vmatpush.msra.mxu3 %v273_v47  ;;  %v264_v62 = vld [vmem:[#allocation13 + $0x68] sm:$0xff]  ;;  %v205_v4 = vld [vmem:[#allocation5 + $0x8] sm:$0xff]  ;;  %v283_v8 = vld [vmem:[#allocation13 + $0x100] sm:$0xff] }
  0x3c   :  { %190 = vmatpush.msra.mxu0 %v163_v32  ;;  %315 = vmatpush.msra.mxu2 %v272_v45  ;;  %v260_v63 = vld [vmem:[#allocation13 + $0x48] sm:$0xff]  ;;  %v286_v5 = vld [vmem:[#allocation13 + $0x118] sm:$0xff]  ;;  %v257_v6 = vld [vmem:[#allocation13 + $0x30] sm:$0xff] }
  0x3d   :  { %237 = vmatpush.msra.mxu1 %v210_v34  ;;  %339 = vmatpush.msra.mxu3 %v270_v54  ;;  %v158_v2 = vld [vmem:[#allocation2 + $0x8] sm:$0xff]  ;;  %v258_v7 = vld [vmem:[#allocation13 + $0x38] sm:$0xff]  ;;  %v277_v16 = vld [vmem:[#allocation13 + $0xd0] sm:$0xff] }
  0x3e   :  { %191 = vmatpush.msra.mxu0 %v162_v36  ;;  %316 = vmatpush.msra.mxu2 %v269_v49  ;;  %v412_v9 = vld [vmem:[#allocation14 + $0x120] sm:$0xff]  ;;  %v254_v10 = vld [vmem:[#allocation13 + $0x18] sm:$0xff]  ;;  %v280_v12 = vld [vmem:[#allocation13 + $0xe8] sm:$0xff] }
  0x3f   :  { %238 = vmatpush.msra.mxu1 %v209_v38  ;;  %340 = vmatpush.msra.mxu3 %v267_v58  ;;  %v255_v11 = vld [vmem:[#allocation13 + $0x20] sm:$0xff]  ;;  %v409_v13 = vld [vmem:[#allocation14 + $0x108] sm:$0xff]  ;;  %v406_v17 = vld [vmem:[#allocation14 + $0xf0] sm:$0xff] }
  0x40   :  { %192 = vmatpush.msra.mxu0 %v161_v40  ;;  %317 = vmatpush.msra.mxu2 %v266_v55  ;;  %v251_v14 = vld [vmem:[#allocation13] sm:$0xff]  ;;  %v252_v15 = vld [vmem:[#allocation13 + $0x8] sm:$0xff]  ;;  %v422_v18 = vld [vmem:[#allocation14 + $0x170] sm:$0xff] }
  0x41   :  { %239 = vmatpush.msra.mxu1 %v208_v42  ;;  %341 = vmatpush.msra.mxu3 %v264_v62  ;;  %v423_v19 = vld [vmem:[#allocation14 + $0x178] sm:$0xff]  ;;  %v420_v23 = vld [vmem:[#allocation14 + $0x160] sm:$0xff]  ;;  %v417_v27 = vld [vmem:[#allocation14 + $0x148] sm:$0xff] }
  0x42   :  { %193 = vmatpush.msra.mxu0 %v160_v44  ;;  %318 = vmatpush.msra.mxu2 %v263_v59  ;;  %v274_v20 = vld [vmem:[#allocation13 + $0xb8] sm:$0xff]  ;;  %v271_v24 = vld [vmem:[#allocation13 + $0xa0] sm:$0xff]  ;;  %v268_v28 = vld [vmem:[#allocation13 + $0x88] sm:$0xff] }
  0x43   :  { %240 = vmatpush.msra.mxu1 %v207_v46  ;;  %342 = vmatpush.msra.mxu3 %v261_v3  ;;  %v403_v21 = vld [vmem:[#allocation14 + $0xd8] sm:$0xff]  ;;  %v400_v25 = vld [vmem:[#allocation14 + $0xc0] sm:$0xff]  ;;  %v265_v29 = vld [vmem:[#allocation13 + $0x70] sm:$0xff] }
  0x44   :  { %194 = vmatpush.msra.mxu0 %v159_v48  ;;  %319 = vmatpush.msra.mxu2 %v260_v63  ;;  %v419_v22 = vld [vmem:[#allocation14 + $0x158] sm:$0xff]  ;;  %v416_v26 = vld [vmem:[#allocation14 + $0x140] sm:$0xff]  ;;  %v397_v30 = vld [vmem:[#allocation14 + $0xa8] sm:$0xff] }
  0x45   :  { %195 = vmatmul.f32.vlgmr.msra.gmra.mxu0 %v157_v50  ;;  %241 = vmatpush.msra.mxu1 %v206_v51  ;;  %v413_v31 = vld [vmem:[#allocation14 + $0x128] sm:$0xff]  ;;  %v414_v32 = vld [vmem:[#allocation14 + $0x130] sm:$0xff]  ;;  %v262_v33 = vld [vmem:[#allocation13 + $0x58] sm:$0xff] }
  0x46   :  { %242 = vmatmul.f32.vlgmr.msra.gmra.mxu1 %v204_v52  ;;  %353 = vmatpush.msrb.mxu0 %v298_v53  ;;  %v394_v34 = vld [vmem:[#allocation14 + $0x90] sm:$0xff]  ;;  %v411_v36 = vld [vmem:[#allocation14 + $0x118] sm:$0xff]  ;;  %v259_v37 = vld [vmem:[#allocation13 + $0x40] sm:$0xff] }
  0x47   :  { %432 = vmatpush.msrb.mxu1 %v421_v57  ;;  %320 = vmatpush.msra.mxu2 %v257_v6  ;;  %v410_v35 = vld [vmem:[#allocation14 + $0x110] sm:$0xff]  ;;  %v391_v38 = vld [vmem:[#allocation14 + $0x78] sm:$0xff]  ;;  %v408_v40 = vld [vmem:[#allocation14 + $0x100] sm:$0xff] }
  0x48   :  { %354 = vmatpush.msrb.mxu0 %v295_v56  ;;  %343 = vmatpush.msra.mxu3 %v258_v7  ;;  %v407_v39 = vld [vmem:[#allocation14 + $0xf8] sm:$0xff]  ;;  %v256_v41 = vld [vmem:[#allocation13 + $0x28] sm:$0xff]  ;;  %v388_v42 = vld [vmem:[#allocation14 + $0x60] sm:$0xff] }
  0x49   :  { %433 = vmatpush.msrb.mxu1 %v418_v61  ;;  %321 = vmatpush.msra.mxu2 %v254_v10  ;;  %v404_v43 = vld [vmem:[#allocation14 + $0xe0] sm:$0xff]  ;;  %v405_v44 = vld [vmem:[#allocation14 + $0xe8] sm:$0xff]  ;;  %v253_v45 = vld [vmem:[#allocation13 + $0x10] sm:$0xff] }
  0x4a   :  { %355 = vmatpush.msrb.mxu0 %v292_v60  ;;  %344 = vmatpush.msra.mxu3 %v255_v11  ;;  %v385_v46 = vld [vmem:[#allocation14 + $0x48] sm:$0xff]  ;;  %v402_v48 = vld [vmem:[#allocation14 + $0xd0] sm:$0xff]  ;;  %v399_v51 = vld [vmem:[#allocation14 + $0xb8] sm:$0xff] }
  0x4b   :  { %434 = vmatpush.msrb.mxu1 %v415_v1  ;;  %322 = vmatpush.msra.mxu2 %v251_v14  ;;  %v401_v47 = vld [vmem:[#allocation14 + $0xc8] sm:$0xff]  ;;  %v382_v49 = vld [vmem:[#allocation14 + $0x30] sm:$0xff]  ;;  %v379_v52 = vld [vmem:[#allocation14 + $0x18] sm:$0xff] }
  0x4c   :  { %356 = vmatpush.msrb.mxu0 %v289_v0  ;;  %345 = vmatpush.msra.mxu3 %v252_v15  ;;  %v398_v50 = vld [vmem:[#allocation14 + $0xb0] sm:$0xff]  ;;  %v395_v53 = vld [vmem:[#allocation14 + $0x98] sm:$0xff]  ;;  %v396_v54 = vld [vmem:[#allocation14 + $0xa0] sm:$0xff] }
  0x4d   :  { %198 = vmatmul.f32.gmra.mxu0 %v158_v2  ;;  %435 = vmatpush.msrb.mxu1 %v412_v9  ;;  %v376_v55 = vld [vmem:[#allocation14] sm:$0xff]  ;;  %v393_v57 = vld [vmem:[#allocation14 + $0x88] sm:$0xff]  ;;  %v390_v59 = vld [vmem:[#allocation14 + $0x70] sm:$0xff] }
  0x4e   :  { %245 = vmatmul.f32.gmra.mxu1 %v205_v4  ;;  %357 = vmatpush.msrb.mxu0 %v286_v5  ;;  %v392_v56 = vld [vmem:[#allocation14 + $0x80] sm:$0xff]  ;;  %v389_v58 = vld [vmem:[#allocation14 + $0x68] sm:$0xff]  ;;  %v386_v60 = vld [vmem:[#allocation14 + $0x50] sm:$0xff] }
  0x4f   :  { %436 = vmatpush.msrb.mxu1 %v409_v13  ;;  %455 = vmatpush.msrb.mxu2 %v422_v18  ;;  %v387_v61 = vld [vmem:[#allocation14 + $0x58] sm:$0xff]  ;;  %v384_v63 = vld [vmem:[#allocation14 + $0x40] sm:$0xff]  ;;  %v381_v1 = vld [vmem:[#allocation14 + $0x28] sm:$0xff] }
  0x50   :  { %358 = vmatpush.msrb.mxu0 %v283_v8  ;;  %478 = vmatpush.msrb.mxu3 %v423_v19  ;;  %v383_v62 = vld [vmem:[#allocation14 + $0x38] sm:$0xff]  ;;  %v380_v0 = vld [vmem:[#allocation14 + $0x20] sm:$0xff]  ;;  %v377_v2 = vld [vmem:[#allocation14 + $0x8] sm:$0xff] }
  0x51   :  { %437 = vmatpush.msrb.mxu1 %v406_v17  ;;  %456 = vmatpush.msrb.mxu2 %v419_v22  ;;  %v378_v3 = vld [vmem:[#allocation14 + $0x10] sm:$0xff]  ;;  %v565_v4 = vld [vmem:[#allocation8] ss:$0 sm:$0xff]  ;;  %v566_v5 = vld [vmem:[#allocation11] ss:$0 sm:$0xff] }
  0x52   :  { %359 = vmatpush.msrb.mxu0 %v280_v12  ;;  %479 = vmatpush.msrb.mxu3 %v420_v23  ;;  %v299_v22 = vld [vmem:[%s954_s7] sm:$0x7]  ;;  %s843_s7 = smov [#allocation16]  }
  0x53   :  { %438 = vmatpush.msrb.mxu1 %v403_v21  ;;  %457 = vmatpush.msrb.mxu2 %v416_v26  ;;  %v301_v26 = vperm.slane %v299_v22, 0 }
  0x54   :  { %360 = vmatpush.msrb.mxu0 %v277_v16  ;;  %480 = vmatpush.msrb.mxu3 %v417_v27  ;;  %v302_v27 = vperm.slane %v299_v22, 1 }
  0x55   :  { %439 = vmatpush.msrb.mxu1 %v400_v25  ;;  %458 = vmatpush.msrb.mxu2 %v413_v31 }
  0x56   :  { %361 = vmatpush.msrb.mxu0 %v274_v20  ;;  %481 = vmatpush.msrb.mxu3 %v414_v32  ;;  %v424_v20 = vld [vmem:[%s956_s9] sm:$0x7]  ;;  %s533_s9 = sshll.u32 %s843_s7, 4  ;;  %s534_s9 = int_to_ptr.vmem [resolvable:$true] %s533_s9 }
  0x57   :  { %440 = vmatpush.msrb.mxu1 %v397_v30  ;;  %459 = vmatpush.msrb.mxu2 %v410_v35  ;;  %v426_v23 = vperm.slane %v424_v20, 0  ;;  %v303_v30 = vperm.slane %v299_v22, 2  ;;  %v427_v32 = vperm.slane %v424_v20, 1 }
  0x58   :  { %362 = vmatpush.msrb.mxu0 %v271_v24  ;;  %482 = vmatpush.msrb.mxu3 %v411_v36 }
  0x59   :  { %441 = vmatpush.msrb.mxu1 %v394_v34  ;;  %460 = vmatpush.msrb.mxu2 %v407_v39 }
  0x5a   :  { %363 = vmatpush.msrb.mxu0 %v268_v28  ;;  %483 = vmatpush.msrb.mxu3 %v408_v40 }
  0x5b   :  { %442 = vmatpush.msrb.mxu1 %v391_v38  ;;  %461 = vmatpush.msrb.mxu2 %v404_v43 }
  0x5c   :  { %364 = vmatpush.msrb.mxu0 %v265_v29  ;;  %484 = vmatpush.msrb.mxu3 %v405_v44 }
  0x5d   :  { %443 = vmatpush.msrb.mxu1 %v388_v42  ;;  %462 = vmatpush.msrb.mxu2 %v401_v47 }
  0x5e   :  { %365 = vmatpush.msrb.mxu0 %v262_v33  ;;  %485 = vmatpush.msrb.mxu3 %v402_v48  ;;  %v428_v33 = vperm.slane %v424_v20, 2 }
  0x5f   :  { %444 = vmatpush.msrb.mxu1 %v385_v46  ;;  %463 = vmatpush.msrb.mxu2 %v398_v50 }
  0x60   :  { %366 = vmatpush.msrb.mxu0 %v259_v37  ;;  %486 = vmatpush.msrb.mxu3 %v399_v51 }
  0x61   :  { %445 = vmatpush.msrb.mxu1 %v382_v49  ;;  %464 = vmatpush.msrb.mxu2 %v395_v53 }
  0x62   :  { %367 = vmatpush.msrb.mxu0 %v256_v41  ;;  %487 = vmatpush.msrb.mxu3 %v396_v54 }
  0x63   :  { %446 = vmatpush.msrb.mxu1 %v379_v52  ;;  %465 = vmatpush.msrb.mxu2 %v392_v56 }
  0x64   :  { %368 = vmatpush.msrb.mxu0 %v253_v45  ;;  %488 = vmatpush.msrb.mxu3 %v393_v57 }
  0x65   :  { %447 = vmatpush.msrb.mxu1 %v376_v55  ;;  %466 = vmatpush.msrb.mxu2 %v389_v58 }
  0x66   :  { %489 = vmatpush.msrb.mxu3 %v390_v59 }
  0x67   :  { %467 = vmatpush.msrb.mxu2 %v386_v60 }
  0x68   :  { %490 = vmatpush.msrb.mxu3 %v387_v61 }
  0x69   :  { %468 = vmatpush.msrb.mxu2 %v383_v62 }
  0x6a   :  { %491 = vmatpush.msrb.mxu3 %v384_v63 }
  0x6b   :  { %469 = vmatpush.msrb.mxu2 %v380_v0 }
  0x6c   :  { %492 = vmatpush.msrb.mxu3 %v381_v1 }
  0x6d   :  { %470 = vmatpush.msrb.mxu2 %v377_v2 }
  0x6e   :  { %493 = vmatpush.msrb.mxu3 %v378_v3 }
  0xc2   :  { %v196_v6 = vpop.f32.mrf.mxu0 }
  0xc3   :  { %v197_v7 = vadd.f32 %v565_v4, %v196_v6  ;;  %v243_v8 = vpop.f32.mrf.mxu1 }
  0xc4   :  { %v244_v9 = vadd.f32 %v566_v5, %v243_v8 }
  0xc5   :  { %567 = vtanh.f32 %v197_v7 }
  0xc6   :  { %569 = vtanh.f32 %v244_v9 }
  0xca   :  { %v199_v10 = vpop.f32.mrf.mxu0 }
  0xcb   :  { %v568_v11 = vpop.eup %567  ;;  %v200_v12 = vadd.f32 %v565_v4, %v199_v10  ;;  %v246_v13 = vpop.f32.mrf.mxu1 }
  0xcc   :  { %v570_v14 = vpop.eup %569  ;;  %323 = vmatmul.f32.vlgmr.msra.gmra.mxu2 %v568_v11  ;;  %346 = vmatmul.f32.vlgmr.msra.gmra.mxu3 %v568_v11  ;;  %v247_v15 = vadd.f32 %v566_v5, %v246_v13 }
  0xcd   :  { %571 = vtanh.f32 %v200_v12  ;;  %369 = vmatmul.f32.vlgmr.msrb.gmra.mxu0 %v568_v11  ;;  %448 = vmatmul.f32.vlgmr.msrb.gmra.mxu1 %v570_v14 }
  0xce   :  { %573 = vtanh.f32 %v247_v15 }
  0xd3   :  { %v572_v16 = vpop.eup %571 }
  0xd4   :  { %v574_v17 = vpop.eup %573  ;;  %326 = vmatmul.f32.gmra.mxu2 %v572_v16  ;;  %349 = vmatmul.f32.gmra.mxu3 %v572_v16 }
  0xd5   :  { %372 = vmatmul.f32.gmra.mxu0 %v572_v16  ;;  %451 = vmatmul.f32.gmra.mxu1 %v574_v17 }
  0xdc   :  { %471 = vmatmul.f32.vlgmr.msrb.gmra.mxu2 %v570_v14  ;;  %494 = vmatmul.f32.vlgmr.msrb.gmra.mxu3 %v570_v14 }
  0xe4   :  { %474 = vmatmul.f32.gmra.mxu2 %v574_v17  ;;  %497 = vmatmul.f32.gmra.mxu3 %v574_v17 }
 0x14a   :  { %v449_v21 = vpop.f32.mrf.mxu1  ;;  %v370_v28 = vpop.f32.mrf.mxu0 }
 0x14b   :  { %v450_v29 = vadd.f32 %v449_v21, %v426_v23  ;;  %v371_v37 = vadd.f32 %v370_v28, %v303_v30 }
 0x14d   :  { %575 = vtanh.f32 %v450_v29 }
 0x14f   :  { %v324_v18 = vpop.f32.mrf.mxu2  ;;  %v347_v19 = vpop.f32.mrf.mxu3 }
 0x150   :  { %v325_v31 = vadd.f32 %v324_v18, %v301_v26  ;;  %v348_v34 = vadd.f32 %v347_v19, %v302_v27 }
 0x152   :  { %577 = vtanh.f32 %v325_v31  ;;  %v452_v38 = vpop.f32.mrf.mxu1  ;;  %v373_v44 = vpop.f32.mrf.mxu0 }
 0x153   :  { %579 = vtanh.f32 %v348_v34  ;;  %v453_v41 = vadd.f32 %v452_v38, %v426_v23  ;;  %v576_v43 = vpop.eup %575  ;;  %v374_v51 = vadd.f32 %v373_v44, %v303_v30 }
 0x157   :  { %v327_v24 = vpop.f32.mrf.mxu2  ;;  %v350_v25 = vpop.f32.mrf.mxu3 }
 0x158   :  { %v328_v42 = vadd.f32 %v327_v24, %v301_v26  ;;  %v351_v45 = vadd.f32 %v350_v25, %v302_v27  ;;  %v578_v46 = vpop.eup %577 }
 0x159   :  { %v580_v47 = vpop.eup %579  ;;  %v505_v55 = vmul.f32 %v578_v46, %v576_v43 }
 0x15f   :  { %v472_v35 = vpop.f32.mrf.mxu2  ;;  %v495_v36 = vpop.f32.mrf.mxu3 }
 0x160   :  { %v473_v39 = vadd.f32 %v472_v35, %v427_v32  ;;  %v496_v40 = vadd.f32 %v495_v36, %v428_v33 }
 0x162   :  { %581 = vtanh.f32 %v473_v39 }
 0x163   :  { %583 = vtanh.f32 %v496_v40 }
 0x164   :  { %585 = vtanh.f32 %v371_v37 }
 0x165   :  { %587 = vtanh.f32 %v453_v41 }
 0x166   :  { %589 = vtanh.f32 %v328_v42 }
 0x167   :  { %v475_v48 = vpop.f32.mrf.mxu2  ;;  %v498_v49 = vpop.f32.mrf.mxu3  ;;  %591 = vtanh.f32 %v351_v45 }
 0x168   :  { %v582_v50 = vpop.eup %581  ;;  %v476_v52 = vadd.f32 %v475_v48, %v427_v32  ;;  %v499_v53 = vadd.f32 %v498_v49, %v428_v33 }
 0x169   :  { %v584_v54 = vpop.eup %583  ;;  %v513_v56 = vmul.f32 %v582_v50, %v580_v47 }
 0x16a   :  { %v586_v57 = vpop.eup %585  ;;  %593 = vtanh.f32 %v476_v52 }
 0x16b   :  { %v515_v58 = vadd.f32 %v513_v56, %v505_v55  ;;  %v521_v59 = vmul.f32 %v586_v57, %v584_v54  ;;  %595 = vtanh.f32 %v499_v53  ;;  %v588_v60 = vpop.eup %587 }
 0x16c   :  { %597 = vtanh.f32 %v374_v51  ;;  %v590_v62 = vpop.eup %589 }
 0x16d   :  { %v523_v61 = vadd.f32 %v521_v59, %v515_v58  ;;  %v592_v63 = vpop.eup %591  ;;  %v506_v2 = vmul.f32 %v590_v62, %v588_v60 }
 0x16f   :  { %599 = vtanh.f32 %v523_v61 }
 0x170   :  { %v594_v0 = vpop.eup %593 }
 0x171   :  { %v596_v1 = vpop.eup %595  ;;  %v514_v3 = vmul.f32 %v594_v0, %v592_v63 }
 0x172   :  { %v598_v4 = vpop.eup %597 }
 0x173   :  { %v516_v5 = vadd.f32 %v514_v3, %v506_v2  ;;  %v522_v6 = vmul.f32 %v598_v4, %v596_v1 }
 0x175   :  { %v600_v7 = vpop.eup %599  ;;  %v524_v8 = vadd.f32 %v522_v6, %v516_v5 }
 0x176   :  { %527 = vst [vmem:[#allocation16] sm:$0xff] %v600_v7 }
 0x177   :  { %601 = vtanh.f32 %v524_v8 }
 0x17d   :  { %v602_v9 = vpop.eup %601 }
 0x17e   :  { %528 = vst [vmem:[#allocation16 + $0x8] sm:$0xff] %v602_v9 }
 0x17f   :  { %541 = dma.vmem_to_hbm [thread:$0]  %s534_s9, 256, %s536_s15, [#allocation4], %s832_s21, %s832_s21, %s833_s22  }
 0x180   :  { %829 = dma.done.wait [#allocation4], 256  }
 0x181   :  { %830 = vsyncadd [#allocation4], 4294967040 }
 0x182   :  { %546 = vsyncpa [#allocation3], 1 }
 0x183   :  { %547 = vsyncpa [#allocation6], 1 }
 0x184   :  { %548 = vsyncpa [#allocation9], 1 }
 0x185   :  { %549 = vsyncpa [#allocation12], 1 }
 0x186   :  { %550 = vsyncpa [#allocation15], 1 }
 0x187   :  { %551 = vsyncpa [#allocation4], 1 }

</bundles_post_ra>
